<compile_context>
chip_gen: v7x
topology: tpu7x:2x2x1
jax: 0.10.0
libtpu: 0.0.40
codegen_flags: <defaults>
</compile_context>

<pallas_src>
import functools

import jax
import jax.numpy as jnp
from jax.experimental import pallas as pl
from jax.experimental.pallas import tpu as pltpu


# ---------------------------------------------------------------------------
# Module structure (mirrors the PyTorch RFBlock constructor).
# ---------------------------------------------------------------------------
def rfblock_layer_spec(level, num_feat):
    """Per-branch list of (ksize, cin, cout, dilation)."""
    F = num_feat
    branches = [[(1, 2 * F, F, 1), (3, F, F, 1)]]          # rfblock[0]
    for idx in range(level - 1):
        dil = 2 ** (idx + 2) - 1
        kernel = dil - 3
        layers = [(3, 2 * F, F, 1)]
        while kernel > 0:
            layers.append((5, F, F, 1))
            kernel -= 4
        layers.append((3, F, F, dil))
        branches.append(layers)
    return branches


def init_rfblock_params(key, level, num_feat):
    """Deterministic synthetic init (PyTorch-style uniform fan-in bounds)."""
    def conv_param(k, ksize, cin, cout):
        k1, k2 = jax.random.split(k)
        bound = 1.0 / float(jnp.sqrt(cin * ksize * ksize))
        w = jax.random.uniform(k1, (ksize, ksize, cin, cout), jnp.float32,
                               -bound, bound)
        b = jax.random.uniform(k2, (cout,), jnp.float32, -bound, bound)
        return w, b

    spec = rfblock_layer_spec(level, num_feat)
    params = {"branches": [], "last": None}
    for branch in spec:
        layers = []
        for (ksize, cin, cout, dil) in branch:
            key, sub = jax.random.split(key)
            w, b = conv_param(sub, ksize, cin, cout)
            layers.append((w, b, dil))
        params["branches"].append(layers)
    if level > 1:
        key, sub = jax.random.split(key)
        w, b = conv_param(sub, 1, num_feat * len(spec), num_feat)
        params["last"] = (w, b)
    return params


# ---------------------------------------------------------------------------
# Wrapper-side weight preparation: block-structured (shift (x) tap) matrices.
# ---------------------------------------------------------------------------
def _shift_kron(w2d, Wdim, off):
    """(W*cin, W*cout) matrix whose (wi, wo) block is w2d iff wi == wo + off."""
    cin, cout = w2d.shape
    wi = jnp.arange(Wdim)[:, None]
    wo = jnp.arange(Wdim)[None, :]
    S = (wi == (wo + off)).astype(w2d.dtype)
    return jnp.einsum("ab,cd->acbd", S, w2d).reshape(Wdim * cin, Wdim * cout)


def _row_weights(w_hwio, Wdim, dil):
    """Stack over kh of row-structured weights folding all kw taps + W-padding."""
    k = w_hwio.shape[0]
    pad = dil * (k - 1) // 2
    mats = []
    for kh in range(k):
        m = None
        for kw in range(k):
            blk = _shift_kron(w_hwio[kh, kw], Wdim, kw * dil - pad)
            m = blk if m is None else m + blk
        mats.append(m)
    return jnp.stack(mats, axis=0)                 # (k, W*cin, W*cout)


def _pick_block_batch(N, H, target_rows=256):
    """Largest divisor B of N with B*H <= target_rows, a sublane-aligned block,
    and (when N >= 2) at least two grid steps so v7x megacore can split the
    batch across its two TensorCores."""
    best = None
    for b in range(1, N + 1):
        if N % b != 0:
            continue
        if (b * H) % 8 != 0 and b != N:
            continue
        if N >= 2 and N // b < 2:
            continue
        if b * H > target_rows:
            continue
        best = b
    return best if best is not None else N


# ---------------------------------------------------------------------------
# Fused RFBlock kernel (B images == one lane-dense slab per grid step).
# ---------------------------------------------------------------------------
def _rfblock_kernel(*refs, spec, B, H, W, num_feat, level, neg_slope,
                    compute_dtype):
    F = num_feat
    BH = B * H
    n_layers = sum(len(b) for b in spec)
    has_last = level > 1

    x_ref = refs[0]
    pos = 1
    layer_refs = []
    for _ in range(n_layers):
        layer_refs.append((refs[pos], refs[pos + 1]))
        pos += 2
    if has_last:
        wlast_ref = refs[pos]
        blast_ref = refs[pos + 1]
        pos += 2
    o_ref = refs[pos]

    # Image-local row index of every slab row, hoisted once and reused by all
    # tap masks (vertical taps must not leak across image seams in the block).
    rim = jax.lax.broadcasted_iota(jnp.int32, (BH, 1), 0) % H

    def lrelu(v):
        return jnp.where(v >= 0, v, v * neg_slope)

    def mm(a, w):
        if a.dtype != compute_dtype:
            a = a.astype(compute_dtype)
        return jnp.dot(a, w, preferred_element_type=jnp.float32)

    def shifted(act, r):
        # act rows shifted vertically by r *within each image*; zeros outside.
        if r == 0:
            return act
        rolled = pltpu.roll(act, shift=(-r) % BH, axis=0)
        if r > 0:
            valid = rim < (H - r)
        else:
            valid = rim >= (-r)
        return jnp.where(valid, rolled, jnp.zeros_like(rolled))

    def conv(act, w_ref, b_ref, k, dil):
        # act: (BH, W*Cin); w_ref: (k, W*Cin, W*Cout); b_ref: (1, W*Cout)
        pad = dil * (k - 1) // 2
        acc = None                                # register-resident fp32 acc
        for kh in range(k):
            r = kh * dil - pad                    # vertical tap offset
            term = mm(shifted(act, r), w_ref[kh])
            acc = term if acc is None else acc + term
        return lrelu(acc + b_ref[...])

    x = x_ref[...]                                # (BH, W*2F) fp32, lane-dense

    li = 0
    branch_outs = []
    for branch in spec:
        act = x
        for (k, _cin, _cout, dil) in branch:
            w_ref, b_ref = layer_refs[li]
            li += 1
            act = conv(act, w_ref, b_ref, k, dil)
        branch_outs.append(act)

    if has_last:
        # torch.cat(dim=1) + 1x1 last_layer folded into a sum of per-branch
        # matmuls (no concat materialization); no activation on last_layer.
        res = None
        for i, bo in enumerate(branch_outs):
            term = mm(bo, wlast_ref[i])
            res = term if res is None else res + term
        res = res + blast_ref[...]
    else:
        res = branch_outs[0]

    o_ref[...] = res.astype(o_ref.dtype)


# ---------------------------------------------------------------------------
# Host wrapper.
# ---------------------------------------------------------------------------
def rfblock_forward_pallas(x_nchw, params, level, num_feat, *,
                           neg_slope=0.1, compute_dtype=jnp.float32,
                           target_rows_per_step=256):
    """RFBlock.forward: (N, 2F, H, W) -> (N, F, H, W)."""
    N, C, H, W = x_nchw.shape
    F = num_feat
    assert C == 2 * F
    spec = rfblock_layer_spec(level, F)

    B = _pick_block_batch(N, H, target_rows_per_step)
    G = N // B
    BH = B * H

    # NCHW -> lane-dense row-major slab (N*H, W*C), channels fastest per pixel.
    x2d = jnp.transpose(x_nchw, (0, 2, 3, 1)).reshape(N * H, W * C)

    inputs = [x2d]
    in_specs = [pl.BlockSpec((BH, W * C), lambda g: (g, 0))]

    flat_layers = [l for br in spec for l in br]
    flat_params = [lp for br in params["branches"] for lp in br]
    for (k, cin, cout, dil), (w, b, _) in zip(flat_layers, flat_params):
        # Weights cast to the MXU compute dtype once here (not per grid step).
        wstack = _row_weights(w, W, dil).astype(compute_dtype)  # (k,W*cin,W*cout)
        btile = jnp.tile(b, W).reshape(1, W * cout)             # bias stays fp32
        inputs += [wstack, btile]
        in_specs += [
            pl.BlockSpec((k, W * cin, W * cout), lambda g: (0, 0, 0)),
            pl.BlockSpec((1, W * cout), lambda g: (0, 0)),
        ]

    if level > 1:
        wl, bl = params["last"]                    # (1,1,level*F,F), (F,)
        w2d = wl.reshape(level * F, F)
        wlast = jnp.stack(
            [_shift_kron(w2d[i * F:(i + 1) * F, :], W, 0)
             for i in range(level)], axis=0).astype(compute_dtype)
        blast = jnp.tile(bl, W).reshape(1, W * F)
        inputs += [wlast, blast]
        in_specs += [
            pl.BlockSpec((level, W * F, W * F), lambda g: (0, 0, 0)),
            pl.BlockSpec((1, W * F), lambda g: (0, 0)),
        ]

    kernel = functools.partial(
        _rfblock_kernel,
        spec=tuple(tuple(br) for br in spec),
        B=B, H=H, W=W, num_feat=F, level=level,
        neg_slope=neg_slope, compute_dtype=compute_dtype)

    out2d = pl.pallas_call(
        kernel,
        out_shape=jax.ShapeDtypeStruct((N * H, W * F), jnp.float32),
        grid_spec=pltpu.PrefetchScalarGridSpec(
            num_scalar_prefetch=0,
            grid=(G,),
            in_specs=in_specs,
            out_specs=pl.BlockSpec((BH, W * F), lambda g: (g, 0)),
        ),
        compiler_params=pltpu.CompilerParams(
            dimension_semantics=("parallel",),
            vmem_limit_bytes=32 * 1024 * 1024),
    )(*inputs)

    # (N*H, W*F) -> (N, F, H, W)
    return jnp.transpose(out2d.reshape(N, H, W, F), (0, 3, 1, 2))


# ---------------------------------------------------------------------------
# Pure-JAX reference (lax conv) for correctness checking.
# ---------------------------------------------------------------------------
def _conv_lrelu_ref(x_nhwc, w, b, *, dilation=1, lrelu=True, neg_slope=0.1):
    KH = w.shape[0]
    pad = dilation * (KH - 1) // 2
    y = jax.lax.conv_general_dilated(
        x_nhwc, w, window_strides=(1, 1), padding=((pad, pad), (pad, pad)),
        rhs_dilation=(dilation, dilation),
        dimension_numbers=("NHWC", "HWIO", "NHWC"))
    y = y + b
    if lrelu:
        y = jnp.where(y >= 0, y, y * neg_slope)
    return y


def rfblock_forward_ref(x_nchw, params, level, num_feat):
    x = jnp.transpose(x_nchw, (0, 2, 3, 1))
    outs = []
    for branch in params["branches"]:
        h = x
        for (w, b, dil) in branch:
            h = _conv_lrelu_ref(h, w, b, dilation=dil, lrelu=True,
                                neg_slope=0.1)
        outs.append(h)
    if level > 1:
        cat = jnp.concatenate(outs, axis=-1)
        w, b = params["last"]
        out = _conv_lrelu_ref(cat, w, b, dilation=1, lrelu=False)
    else:
        out = outs[0]
    return jnp.transpose(out, (0, 3, 1, 2))


if __name__ == "__main__":
    level = 2
    num_feat = 4
    N, H, W = 2, 16, 16

    key = jax.random.PRNGKey(0)
    key, kx = jax.random.split(key)
    x = jax.random.normal(kx, (N, 2 * num_feat, H, W), jnp.float32)
    params = init_rfblock_params(key, level, num_feat)

    fwd = jax.jit(functools.partial(rfblock_forward_pallas,
                                    level=level, num_feat=num_feat))
    out = jax.block_until_ready(fwd(x, params))

    ref = jax.block_until_ready(rfblock_forward_ref(x, params, level, num_feat))

    assert out.shape == (N, num_feat, H, W), out.shape
    err = float(jnp.max(jnp.abs(out - ref)))
    assert jnp.allclose(out, ref, rtol=1e-3, atol=1e-3), err
    print("KERNEL_OK")
</pallas_src>

<mosaic_0001>
module attributes {stable_mosaic.version = 11 : i64} {
  func.func @_rfblock_kernel(%arg0: i32, %arg1: memref<16x128xf32, #tpu.memory_space<vmem>>, %arg2: memref<1x128x64xf32, #tpu.memory_space<vmem>>, %arg3: memref<1x64xf32, #tpu.memory_space<vmem>>, %arg4: memref<3x64x64xf32, #tpu.memory_space<vmem>>, %arg5: memref<1x64xf32, #tpu.memory_space<vmem>>, %arg6: memref<3x128x64xf32, #tpu.memory_space<vmem>>, %arg7: memref<1x64xf32, #tpu.memory_space<vmem>>, %arg8: memref<3x64x64xf32, #tpu.memory_space<vmem>>, %arg9: memref<1x64xf32, #tpu.memory_space<vmem>>, %arg10: memref<2x64x64xf32, #tpu.memory_space<vmem>>, %arg11: memref<1x64xf32, #tpu.memory_space<vmem>>, %arg12: memref<16x64xf32, #tpu.memory_space<vmem>>) attributes {dimension_semantics = [#tpu.dimension_semantics<parallel>], iteration_bounds = array<i64: 2>, scalar_prefetch = 0 : i64, scratch_operands = 0 : i64, tpu.core_type = #tpu.core_type<tc>, window_params = [{transform_indices = @transform_0, window_bounds = array<i64: 16, 128>}, {pipeline_mode = #tpu.pipeline_mode<synchronous>, transform_indices = @transform_1, window_bounds = array<i64: 1, 128, 64>}, {pipeline_mode = #tpu.pipeline_mode<synchronous>, transform_indices = @transform_2, window_bounds = array<i64: 1, 64>}, {pipeline_mode = #tpu.pipeline_mode<synchronous>, transform_indices = @transform_3, window_bounds = array<i64: 3, 64, 64>}, {pipeline_mode = #tpu.pipeline_mode<synchronous>, transform_indices = @transform_4, window_bounds = array<i64: 1, 64>}, {pipeline_mode = #tpu.pipeline_mode<synchronous>, transform_indices = @transform_5, window_bounds = array<i64: 3, 128, 64>}, {pipeline_mode = #tpu.pipeline_mode<synchronous>, transform_indices = @transform_6, window_bounds = array<i64: 1, 64>}, {pipeline_mode = #tpu.pipeline_mode<synchronous>, transform_indices = @transform_7, window_bounds = array<i64: 3, 64, 64>}, {pipeline_mode = #tpu.pipeline_mode<synchronous>, transform_indices = @transform_8, window_bounds = array<i64: 1, 64>}, {pipeline_mode = #tpu.pipeline_mode<synchronous>, transform_indices = @transform_9, window_bounds = array<i64: 2, 64, 64>}, {pipeline_mode = #tpu.pipeline_mode<synchronous>, transform_indices = @transform_10, window_bounds = array<i64: 1, 64>}, {transform_indices = @transform_11, window_bounds = array<i64: 16, 64>}]} {
    %0 = tpu.iota {dimensions = array<i32: 0>} : vector<16x1xi32>
    %c16_i32 = arith.constant 16 : i32
    %c0_i32 = arith.constant 0 : i32
    %1 = arith.cmpi eq, %c16_i32, %c0_i32 : i32
    %c1_i32 = arith.constant 1 : i32
    %2 = arith.select %1, %c1_i32, %c16_i32 : i32
    %3 = vector.broadcast %2 : i32 to vector<16x1xi32>
    %4 = arith.remsi %0, %3 : vector<16x1xi32>
    %c0_i32_0 = arith.constant 0 : i32
    %5 = vector.broadcast %c0_i32_0 : i32 to vector<16x1xi32>
    %6 = arith.cmpi ne, %4, %5 : vector<16x1xi32>
    %c0_i32_1 = arith.constant 0 : i32
    %7 = vector.broadcast %c0_i32_1 : i32 to vector<16x1xi32>
    %8 = arith.cmpi slt, %4, %7 : vector<16x1xi32>
    %c0_i32_2 = arith.constant 0 : i32
    %9 = arith.cmpi slt, %2, %c0_i32_2 : i32
    %10 = vector.broadcast %9 : i1 to vector<16x1xi1>
    %11 = vector.broadcast %10 : vector<16x1xi1> to vector<16x1xi1>
    %12 = arith.xori %8, %11 : vector<16x1xi1>
    %13 = arith.andi %12, %6 : vector<16x1xi1>
    %14 = vector.broadcast %2 : i32 to vector<16x1xi32>
    %15 = arith.addi %4, %14 : vector<16x1xi32>
    %16 = arith.select %13, %15, %4 : vector<16x1xi1>, vector<16x1xi32>
    %c0 = arith.constant 0 : index
    %c0_3 = arith.constant 0 : index
    %17 = vector.load %arg1[%c0, %c0_3] : memref<16x128xf32, #tpu.memory_space<vmem>>, vector<16x128xf32>
    %c0_4 = arith.constant 0 : index
    %c0_5 = arith.constant 0 : index
    %c0_6 = arith.constant 0 : index
    %18 = vector.load %arg2[%c0_4, %c0_5, %c0_6] : memref<1x128x64xf32, #tpu.memory_space<vmem>>, vector<1x128x64xf32>
    %19 = vector.shape_cast %18 : vector<1x128x64xf32> to vector<128x64xf32>
    %cst = arith.constant dense<0.000000e+00> : vector<16x64xf32>
    %20 = tpu.matmul %17, %19, %cst {dimension_numbers = #tpu.dot_dimension_numbers<[1], [0], [0], [1], [0, 0, 1, 1], [], []>} : vector<16x128xf32>, vector<128x64xf32>, vector<16x64xf32> -> vector<16x64xf32>
    %c0_7 = arith.constant 0 : index
    %c0_8 = arith.constant 0 : index
    %21 = vector.load %arg3[%c0_7, %c0_8] : memref<1x64xf32, #tpu.memory_space<vmem>>, vector<1x64xf32>
    %22 = vector.broadcast %21 : vector<1x64xf32> to vector<16x64xf32>
    %23 = arith.addf %20, %22 : vector<16x64xf32>
    %cst_9 = arith.constant 0.000000e+00 : f32
    %24 = vector.broadcast %cst_9 : f32 to vector<16x64xf32>
    %25 = arith.cmpf oge, %23, %24 : vector<16x64xf32>
    %cst_10 = arith.constant 1.000000e-01 : f32
    %26 = vector.broadcast %cst_10 : f32 to vector<16x64xf32>
    %27 = arith.mulf %23, %26 : vector<16x64xf32>
    %28 = arith.select %25, %23, %27 : vector<16x64xi1>, vector<16x64xf32>
    %c1_i32_11 = arith.constant 1 : i32
    %29 = tpu.dynamic_rotate %28 by %c1_i32_11 dim 0 : vector<16x64xf32>, i32 -> vector<16x64xf32>
    %c1_i32_12 = arith.constant 1 : i32
    %30 = vector.broadcast %c1_i32_12 : i32 to vector<16x1xi32>
    %31 = arith.cmpi sge, %16, %30 : vector<16x1xi32>
    %cst_13 = arith.constant 0.000000e+00 : f32
    %32 = vector.broadcast %cst_13 : f32 to vector<16x64xf32>
    %33 = vector.shape_cast %31 : vector<16x1xi1> to vector<16x1xi1>
    %34 = vector.broadcast %33 : vector<16x1xi1> to vector<16x64xi1>
    %35 = arith.select %34, %29, %32 : vector<16x64xi1>, vector<16x64xf32>
    %c0_14 = arith.constant 0 : index
    %c0_15 = arith.constant 0 : index
    %c0_16 = arith.constant 0 : index
    %36 = vector.load %arg4[%c0_14, %c0_15, %c0_16] : memref<3x64x64xf32, #tpu.memory_space<vmem>>, vector<1x64x64xf32>
    %37 = vector.shape_cast %36 : vector<1x64x64xf32> to vector<64x64xf32>
    %cst_17 = arith.constant dense<0.000000e+00> : vector<16x64xf32>
    %38 = tpu.matmul %35, %37, %cst_17 {dimension_numbers = #tpu.dot_dimension_numbers<[1], [0], [0], [1], [0, 0, 1, 1], [], []>} : vector<16x64xf32>, vector<64x64xf32>, vector<16x64xf32> -> vector<16x64xf32>
    %c1 = arith.constant 1 : index
    %c0_18 = arith.constant 0 : index
    %c0_19 = arith.constant 0 : index
    %39 = vector.load %arg4[%c1, %c0_18, %c0_19] : memref<3x64x64xf32, #tpu.memory_space<vmem>>, vector<1x64x64xf32>
    %40 = vector.shape_cast %39 : vector<1x64x64xf32> to vector<64x64xf32>
    %cst_20 = arith.constant dense<0.000000e+00> : vector<16x64xf32>
    %41 = tpu.matmul %28, %40, %cst_20 {dimension_numbers = #tpu.dot_dimension_numbers<[1], [0], [0], [1], [0, 0, 1, 1], [], []>} : vector<16x64xf32>, vector<64x64xf32>, vector<16x64xf32> -> vector<16x64xf32>
    %42 = arith.addf %38, %41 : vector<16x64xf32>
    %c15_i32 = arith.constant 15 : i32
    %43 = tpu.dynamic_rotate %28 by %c15_i32 dim 0 : vector<16x64xf32>, i32 -> vector<16x64xf32>
    %c15_i32_21 = arith.constant 15 : i32
    %44 = vector.broadcast %c15_i32_21 : i32 to vector<16x1xi32>
    %45 = arith.cmpi slt, %16, %44 : vector<16x1xi32>
    %cst_22 = arith.constant 0.000000e+00 : f32
    %46 = vector.broadcast %cst_22 : f32 to vector<16x64xf32>
    %47 = vector.shape_cast %45 : vector<16x1xi1> to vector<16x1xi1>
    %48 = vector.broadcast %47 : vector<16x1xi1> to vector<16x64xi1>
    %49 = arith.select %48, %43, %46 : vector<16x64xi1>, vector<16x64xf32>
    %c2 = arith.constant 2 : index
    %c0_23 = arith.constant 0 : index
    %c0_24 = arith.constant 0 : index
    %50 = vector.load %arg4[%c2, %c0_23, %c0_24] : memref<3x64x64xf32, #tpu.memory_space<vmem>>, vector<1x64x64xf32>
    %51 = vector.shape_cast %50 : vector<1x64x64xf32> to vector<64x64xf32>
    %cst_25 = arith.constant dense<0.000000e+00> : vector<16x64xf32>
    %52 = tpu.matmul %49, %51, %cst_25 {dimension_numbers = #tpu.dot_dimension_numbers<[1], [0], [0], [1], [0, 0, 1, 1], [], []>} : vector<16x64xf32>, vector<64x64xf32>, vector<16x64xf32> -> vector<16x64xf32>
    %53 = arith.addf %42, %52 : vector<16x64xf32>
    %c0_26 = arith.constant 0 : index
    %c0_27 = arith.constant 0 : index
    %54 = vector.load %arg5[%c0_26, %c0_27] : memref<1x64xf32, #tpu.memory_space<vmem>>, vector<1x64xf32>
    %55 = vector.broadcast %54 : vector<1x64xf32> to vector<16x64xf32>
    %56 = arith.addf %53, %55 : vector<16x64xf32>
    %cst_28 = arith.constant 0.000000e+00 : f32
    %57 = vector.broadcast %cst_28 : f32 to vector<16x64xf32>
    %58 = arith.cmpf oge, %56, %57 : vector<16x64xf32>
    %cst_29 = arith.constant 1.000000e-01 : f32
    %59 = vector.broadcast %cst_29 : f32 to vector<16x64xf32>
    %60 = arith.mulf %56, %59 : vector<16x64xf32>
    %61 = arith.select %58, %56, %60 : vector<16x64xi1>, vector<16x64xf32>
    %c1_i32_30 = arith.constant 1 : i32
    %62 = tpu.dynamic_rotate %17 by %c1_i32_30 dim 0 : vector<16x128xf32>, i32 -> vector<16x128xf32>
    %c1_i32_31 = arith.constant 1 : i32
    %63 = vector.broadcast %c1_i32_31 : i32 to vector<16x1xi32>
    %64 = arith.cmpi sge, %16, %63 : vector<16x1xi32>
    %cst_32 = arith.constant 0.000000e+00 : f32
    %65 = vector.broadcast %cst_32 : f32 to vector<16x128xf32>
    %66 = vector.shape_cast %64 : vector<16x1xi1> to vector<16x1xi1>
    %67 = vector.broadcast %66 : vector<16x1xi1> to vector<16x128xi1>
    %68 = arith.select %67, %62, %65 : vector<16x128xi1>, vector<16x128xf32>
    %c0_33 = arith.constant 0 : index
    %c0_34 = arith.constant 0 : index
    %c0_35 = arith.constant 0 : index
    %69 = vector.load %arg6[%c0_33, %c0_34, %c0_35] : memref<3x128x64xf32, #tpu.memory_space<vmem>>, vector<1x128x64xf32>
    %70 = vector.shape_cast %69 : vector<1x128x64xf32> to vector<128x64xf32>
    %cst_36 = arith.constant dense<0.000000e+00> : vector<16x64xf32>
    %71 = tpu.matmul %68, %70, %cst_36 {dimension_numbers = #tpu.dot_dimension_numbers<[1], [0], [0], [1], [0, 0, 1, 1], [], []>} : vector<16x128xf32>, vector<128x64xf32>, vector<16x64xf32> -> vector<16x64xf32>
    %c1_37 = arith.constant 1 : index
    %c0_38 = arith.constant 0 : index
    %c0_39 = arith.constant 0 : index
    %72 = vector.load %arg6[%c1_37, %c0_38, %c0_39] : memref<3x128x64xf32, #tpu.memory_space<vmem>>, vector<1x128x64xf32>
    %73 = vector.shape_cast %72 : vector<1x128x64xf32> to vector<128x64xf32>
    %cst_40 = arith.constant dense<0.000000e+00> : vector<16x64xf32>
    %74 = tpu.matmul %17, %73, %cst_40 {dimension_numbers = #tpu.dot_dimension_numbers<[1], [0], [0], [1], [0, 0, 1, 1], [], []>} : vector<16x128xf32>, vector<128x64xf32>, vector<16x64xf32> -> vector<16x64xf32>
    %75 = arith.addf %71, %74 : vector<16x64xf32>
    %c15_i32_41 = arith.constant 15 : i32
    %76 = tpu.dynamic_rotate %17 by %c15_i32_41 dim 0 : vector<16x128xf32>, i32 -> vector<16x128xf32>
    %c15_i32_42 = arith.constant 15 : i32
    %77 = vector.broadcast %c15_i32_42 : i32 to vector<16x1xi32>
    %78 = arith.cmpi slt, %16, %77 : vector<16x1xi32>
    %cst_43 = arith.constant 0.000000e+00 : f32
    %79 = vector.broadcast %cst_43 : f32 to vector<16x128xf32>
    %80 = vector.shape_cast %78 : vector<16x1xi1> to vector<16x1xi1>
    %81 = vector.broadcast %80 : vector<16x1xi1> to vector<16x128xi1>
    %82 = arith.select %81, %76, %79 : vector<16x128xi1>, vector<16x128xf32>
    %c2_44 = arith.constant 2 : index
    %c0_45 = arith.constant 0 : index
    %c0_46 = arith.constant 0 : index
    %83 = vector.load %arg6[%c2_44, %c0_45, %c0_46] : memref<3x128x64xf32, #tpu.memory_space<vmem>>, vector<1x128x64xf32>
    %84 = vector.shape_cast %83 : vector<1x128x64xf32> to vector<128x64xf32>
    %cst_47 = arith.constant dense<0.000000e+00> : vector<16x64xf32>
    %85 = tpu.matmul %82, %84, %cst_47 {dimension_numbers = #tpu.dot_dimension_numbers<[1], [0], [0], [1], [0, 0, 1, 1], [], []>} : vector<16x128xf32>, vector<128x64xf32>, vector<16x64xf32> -> vector<16x64xf32>
    %86 = arith.addf %75, %85 : vector<16x64xf32>
    %c0_48 = arith.constant 0 : index
    %c0_49 = arith.constant 0 : index
    %87 = vector.load %arg7[%c0_48, %c0_49] : memref<1x64xf32, #tpu.memory_space<vmem>>, vector<1x64xf32>
    %88 = vector.broadcast %87 : vector<1x64xf32> to vector<16x64xf32>
    %89 = arith.addf %86, %88 : vector<16x64xf32>
    %cst_50 = arith.constant 0.000000e+00 : f32
    %90 = vector.broadcast %cst_50 : f32 to vector<16x64xf32>
    %91 = arith.cmpf oge, %89, %90 : vector<16x64xf32>
    %cst_51 = arith.constant 1.000000e-01 : f32
    %92 = vector.broadcast %cst_51 : f32 to vector<16x64xf32>
    %93 = arith.mulf %89, %92 : vector<16x64xf32>
    %94 = arith.select %91, %89, %93 : vector<16x64xi1>, vector<16x64xf32>
    %c3_i32 = arith.constant 3 : i32
    %95 = tpu.dynamic_rotate %94 by %c3_i32 dim 0 : vector<16x64xf32>, i32 -> vector<16x64xf32>
    %c3_i32_52 = arith.constant 3 : i32
    %96 = vector.broadcast %c3_i32_52 : i32 to vector<16x1xi32>
    %97 = arith.cmpi sge, %16, %96 : vector<16x1xi32>
    %cst_53 = arith.constant 0.000000e+00 : f32
    %98 = vector.broadcast %cst_53 : f32 to vector<16x64xf32>
    %99 = vector.shape_cast %97 : vector<16x1xi1> to vector<16x1xi1>
    %100 = vector.broadcast %99 : vector<16x1xi1> to vector<16x64xi1>
    %101 = arith.select %100, %95, %98 : vector<16x64xi1>, vector<16x64xf32>
    %c0_54 = arith.constant 0 : index
    %c0_55 = arith.constant 0 : index
    %c0_56 = arith.constant 0 : index
    %102 = vector.load %arg8[%c0_54, %c0_55, %c0_56] : memref<3x64x64xf32, #tpu.memory_space<vmem>>, vector<1x64x64xf32>
    %103 = vector.shape_cast %102 : vector<1x64x64xf32> to vector<64x64xf32>
    %cst_57 = arith.constant dense<0.000000e+00> : vector<16x64xf32>
    %104 = tpu.matmul %101, %103, %cst_57 {dimension_numbers = #tpu.dot_dimension_numbers<[1], [0], [0], [1], [0, 0, 1, 1], [], []>} : vector<16x64xf32>, vector<64x64xf32>, vector<16x64xf32> -> vector<16x64xf32>
    %c1_58 = arith.constant 1 : index
    %c0_59 = arith.constant 0 : index
    %c0_60 = arith.constant 0 : index
    %105 = vector.load %arg8[%c1_58, %c0_59, %c0_60] : memref<3x64x64xf32, #tpu.memory_space<vmem>>, vector<1x64x64xf32>
    %106 = vector.shape_cast %105 : vector<1x64x64xf32> to vector<64x64xf32>
    %cst_61 = arith.constant dense<0.000000e+00> : vector<16x64xf32>
    %107 = tpu.matmul %94, %106, %cst_61 {dimension_numbers = #tpu.dot_dimension_numbers<[1], [0], [0], [1], [0, 0, 1, 1], [], []>} : vector<16x64xf32>, vector<64x64xf32>, vector<16x64xf32> -> vector<16x64xf32>
    %108 = arith.addf %104, %107 : vector<16x64xf32>
    %c13_i32 = arith.constant 13 : i32
    %109 = tpu.dynamic_rotate %94 by %c13_i32 dim 0 : vector<16x64xf32>, i32 -> vector<16x64xf32>
    %c13_i32_62 = arith.constant 13 : i32
    %110 = vector.broadcast %c13_i32_62 : i32 to vector<16x1xi32>
    %111 = arith.cmpi slt, %16, %110 : vector<16x1xi32>
    %cst_63 = arith.constant 0.000000e+00 : f32
    %112 = vector.broadcast %cst_63 : f32 to vector<16x64xf32>
    %113 = vector.shape_cast %111 : vector<16x1xi1> to vector<16x1xi1>
    %114 = vector.broadcast %113 : vector<16x1xi1> to vector<16x64xi1>
    %115 = arith.select %114, %109, %112 : vector<16x64xi1>, vector<16x64xf32>
    %c2_64 = arith.constant 2 : index
    %c0_65 = arith.constant 0 : index
    %c0_66 = arith.constant 0 : index
    %116 = vector.load %arg8[%c2_64, %c0_65, %c0_66] : memref<3x64x64xf32, #tpu.memory_space<vmem>>, vector<1x64x64xf32>
    %117 = vector.shape_cast %116 : vector<1x64x64xf32> to vector<64x64xf32>
    %cst_67 = arith.constant dense<0.000000e+00> : vector<16x64xf32>
    %118 = tpu.matmul %115, %117, %cst_67 {dimension_numbers = #tpu.dot_dimension_numbers<[1], [0], [0], [1], [0, 0, 1, 1], [], []>} : vector<16x64xf32>, vector<64x64xf32>, vector<16x64xf32> -> vector<16x64xf32>
    %119 = arith.addf %108, %118 : vector<16x64xf32>
    %c0_68 = arith.constant 0 : index
    %c0_69 = arith.constant 0 : index
    %120 = vector.load %arg9[%c0_68, %c0_69] : memref<1x64xf32, #tpu.memory_space<vmem>>, vector<1x64xf32>
    %121 = vector.broadcast %120 : vector<1x64xf32> to vector<16x64xf32>
    %122 = arith.addf %119, %121 : vector<16x64xf32>
    %cst_70 = arith.constant 0.000000e+00 : f32
    %123 = vector.broadcast %cst_70 : f32 to vector<16x64xf32>
    %124 = arith.cmpf oge, %122, %123 : vector<16x64xf32>
    %cst_71 = arith.constant 1.000000e-01 : f32
    %125 = vector.broadcast %cst_71 : f32 to vector<16x64xf32>
    %126 = arith.mulf %122, %125 : vector<16x64xf32>
    %127 = arith.select %124, %122, %126 : vector<16x64xi1>, vector<16x64xf32>
    %c0_72 = arith.constant 0 : index
    %c0_73 = arith.constant 0 : index
    %c0_74 = arith.constant 0 : index
    %128 = vector.load %arg10[%c0_72, %c0_73, %c0_74] : memref<2x64x64xf32, #tpu.memory_space<vmem>>, vector<1x64x64xf32>
    %129 = vector.shape_cast %128 : vector<1x64x64xf32> to vector<64x64xf32>
    %cst_75 = arith.constant dense<0.000000e+00> : vector<16x64xf32>
    %130 = tpu.matmul %61, %129, %cst_75 {dimension_numbers = #tpu.dot_dimension_numbers<[1], [0], [0], [1], [0, 0, 1, 1], [], []>} : vector<16x64xf32>, vector<64x64xf32>, vector<16x64xf32> -> vector<16x64xf32>
    %c1_76 = arith.constant 1 : index
    %c0_77 = arith.constant 0 : index
    %c0_78 = arith.constant 0 : index
    %131 = vector.load %arg10[%c1_76, %c0_77, %c0_78] : memref<2x64x64xf32, #tpu.memory_space<vmem>>, vector<1x64x64xf32>
    %132 = vector.shape_cast %131 : vector<1x64x64xf32> to vector<64x64xf32>
    %cst_79 = arith.constant dense<0.000000e+00> : vector<16x64xf32>
    %133 = tpu.matmul %127, %132, %cst_79 {dimension_numbers = #tpu.dot_dimension_numbers<[1], [0], [0], [1], [0, 0, 1, 1], [], []>} : vector<16x64xf32>, vector<64x64xf32>, vector<16x64xf32> -> vector<16x64xf32>
    %134 = arith.addf %130, %133 : vector<16x64xf32>
    %c0_80 = arith.constant 0 : index
    %c0_81 = arith.constant 0 : index
    %135 = vector.load %arg11[%c0_80, %c0_81] : memref<1x64xf32, #tpu.memory_space<vmem>>, vector<1x64xf32>
    %136 = vector.broadcast %135 : vector<1x64xf32> to vector<16x64xf32>
    %137 = arith.addf %134, %136 : vector<16x64xf32>
    %c0_82 = arith.constant 0 : index
    %c0_83 = arith.constant 0 : index
    %138 = vector.load %arg12[%c0_82, %c0_83] : memref<16x64xf32, #tpu.memory_space<vmem>>, vector<16x64xf32>
    tpu.vector_store %arg12[%c0_82, %c0_83], %137 {strides = array<i32>} : memref<16x64xf32, #tpu.memory_space<vmem>>, vector<16x64xf32>,
    return
  }
  func.func @transform_0(%arg0: i32) -> (i32, i32) {
    %c0_i32 = arith.constant 0 : i32
    %c0_i32_0 = arith.constant 0 : i32
    return %arg0, %c0_i32 : i32, i32
  }
  func.func @transform_1(%arg0: i32) -> (i32, i32, i32) {
    %c0_i32 = arith.constant 0 : i32
    %c0_i32_0 = arith.constant 0 : i32
    %c0_i32_1 = arith.constant 0 : i32
    %c0_i32_2 = arith.constant 0 : i32
    return %c0_i32, %c0_i32_0, %c0_i32_1 : i32, i32, i32
  }
  func.func @transform_2(%arg0: i32) -> (i32, i32) {
    %c0_i32 = arith.constant 0 : i32
    %c0_i32_0 = arith.constant 0 : i32
    %c0_i32_1 = arith.constant 0 : i32
    return %c0_i32, %c0_i32_0 : i32, i32
  }
  func.func @transform_3(%arg0: i32) -> (i32, i32, i32) {
    %c0_i32 = arith.constant 0 : i32
    %c0_i32_0 = arith.constant 0 : i32
    %c0_i32_1 = arith.constant 0 : i32
    %c0_i32_2 = arith.constant 0 : i32
    return %c0_i32, %c0_i32_0, %c0_i32_1 : i32, i32, i32
  }
  func.func @transform_4(%arg0: i32) -> (i32, i32) {
    %c0_i32 = arith.constant 0 : i32
    %c0_i32_0 = arith.constant 0 : i32
    %c0_i32_1 = arith.constant 0 : i32
    return %c0_i32, %c0_i32_0 : i32, i32
  }
  func.func @transform_5(%arg0: i32) -> (i32, i32, i32) {
    %c0_i32 = arith.constant 0 : i32
    %c0_i32_0 = arith.constant 0 : i32
    %c0_i32_1 = arith.constant 0 : i32
    %c0_i32_2 = arith.constant 0 : i32
    return %c0_i32, %c0_i32_0, %c0_i32_1 : i32, i32, i32
  }
  func.func @transform_6(%arg0: i32) -> (i32, i32) {
    %c0_i32 = arith.constant 0 : i32
    %c0_i32_0 = arith.constant 0 : i32
    %c0_i32_1 = arith.constant 0 : i32
    return %c0_i32, %c0_i32_0 : i32, i32
  }
  func.func @transform_7(%arg0: i32) -> (i32, i32, i32) {
    %c0_i32 = arith.constant 0 : i32
    %c0_i32_0 = arith.constant 0 : i32
    %c0_i32_1 = arith.constant 0 : i32
    %c0_i32_2 = arith.constant 0 : i32
    return %c0_i32, %c0_i32_0, %c0_i32_1 : i32, i32, i32
  }
  func.func @transform_8(%arg0: i32) -> (i32, i32) {
    %c0_i32 = arith.constant 0 : i32
    %c0_i32_0 = arith.constant 0 : i32
    %c0_i32_1 = arith.constant 0 : i32
    return %c0_i32, %c0_i32_0 : i32, i32
  }
  func.func @transform_9(%arg0: i32) -> (i32, i32, i32) {
    %c0_i32 = arith.constant 0 : i32
    %c0_i32_0 = arith.constant 0 : i32
    %c0_i32_1 = arith.constant 0 : i32
    %c0_i32_2 = arith.constant 0 : i32
    return %c0_i32, %c0_i32_0, %c0_i32_1 : i32, i32, i32
  }
  func.func @transform_10(%arg0: i32) -> (i32, i32) {
    %c0_i32 = arith.constant 0 : i32
    %c0_i32_0 = arith.constant 0 : i32
    %c0_i32_1 = arith.constant 0 : i32
    return %c0_i32, %c0_i32_0 : i32, i32
  }
  func.func @transform_11(%arg0: i32) -> (i32, i32) {
    %c0_i32 = arith.constant 0 : i32
    %c0_i32_0 = arith.constant 0 : i32
    return %arg0, %c0_i32 : i32, i32
  }
}

</mosaic_0001>

<bundles_post_ra>
// kernel: tile.28
= control target key start
LH: loop header
LB: loop body
LE: loop exit
PB: predicated region body
PF: predicated region fallthrough
CT: control target
= control target key end

     0   :  { %s28_s0 = inlined_call_operand.vmem [shape: f32[4], index: 0, kind: input, shape index: {}]   ;;  %s29_s1 = inlined_call_operand.vmem [shape: f32[16,4], index: 1, kind: output, shape index: {}]  }
   0x1   :  { %v4_v0 = vld [vmem:[%s28_s0] ss:$0 sm:$0xff] }
   0x2   :  { %5 = vst [vmem:[%s29_s1] sm:$0xff] %v4_v0  ;;  %8 = vst [vmem:[%s29_s1 + $0x8] sm:$0xff] %v4_v0 }

// kernel: tile.29
= control target key start
LH: loop header
LB: loop body
LE: loop exit
PB: predicated region body
PF: predicated region fallthrough
CT: control target
= control target key end

     0   :  { %s131_s10 = smov 60   ;;  %s132_s11 = smov 52   ;;  %vm3_vm0 = vcmask 31744   ;;  %vm9_vm1 = vcmask 523744   ;;  %vm15_vm2 = vcmask 490944   ;;  %vm21_vm3 = vcmask 458144   ;;  %s207_s0 = inlined_call_operand.vmem [shape: f32[16,4], index: 0, kind: input, shape index: {}]   ;;  %s208_s1 = inlined_call_operand.vmem [shape: f32[1,64], index: 1, kind: output, shape index: {}]  }
   0x1   :  { %v101_v0 = vld [vmem:[%s207_s0 + $0xf] sm:$0x1]   ;;  %v103_v1 = vld [vmem:[%s207_s0 + $0xd] sm:$0x1]   ;;  %v102_v2 = vld [vmem:[%s207_s0 + $0xe] sm:$0x1]  }
   0x2   :  { %7 = vrot.lane.b32.xlu0 %v101_v0, %s131_s10  ;;  %19 = vrot.lane.b32.xlu1 %v103_v1, %s132_s11  ;;  %v104_v3 = vld [vmem:[%s207_s0 + $0xc] sm:$0x1]   ;;  %s133_s16 = smov 56   ;;  %s134_s17 = smov 48   ;;  %v105_v4 = vld [vmem:[%s207_s0 + $0xb] sm:$0x1]  }
   0x3   :  { %v106_v5 = vld [vmem:[%s207_s0 + $0xa] sm:$0x1]   ;;  %v2_v6 = vld [vmem:[%s207_s0] sm:$0x1]   ;;  %s135_s24 = smov 44   ;;  %s136_s25 = smov 40  }
   0x4   :  { %4 = vst.msk [vmem:[#allocation0] sm:$0x1] %vm3_vm0, %v2_v6   ;;  %v107_v7 = vld [vmem:[%s207_s0 + $0x9] sm:$0x1]   ;;  %v108_v8 = vld [vmem:[%s207_s0 + $0x8] sm:$0x1]  }
   0x5   :  { %s137_s30 = smov 36   ;;  %s138_s2 = smov 32   ;;  %v109_v9 = vld [vmem:[%s207_s0 + $0x7] sm:$0x1]   ;;  %v110_v10 = vld [vmem:[%s207_s0 + $0x6] sm:$0x1]  }
   0x6   :  { %13 = vrot.lane.b32.xlu0 %v102_v2, %s133_s16  ;;  %25 = vrot.lane.b32.xlu1 %v104_v3, %s134_s17  ;;  %s139_s7 = smov 28   ;;  %s140_s8 = smov 24   ;;  %v111_v11 = vld [vmem:[%s207_s0 + $0x5] sm:$0x1]   ;;  %v112_v12 = vld [vmem:[%s207_s0 + $0x4] sm:$0x1]  }
   0x7   :  { %s141_s13 = smov 20   ;;  %s142_s14 = smov 16   ;;  %v113_v13 = vld [vmem:[%s207_s0 + $0x3] sm:$0x1]   ;;  %v114_v14 = vld [vmem:[%s207_s0 + $0x2] sm:$0x1]  }
   0x8   :  { %s143_s19 = smov 12   ;;  %s144_s20 = smov 8   ;;  %v115_v15 = vld [vmem:[%s207_s0 + $0x1] sm:$0x1]   ;;  %vm27_vm4 = vcmask 425344   ;;  %vm33_vm5 = vcmask 392544  }
   0x9   :  { %s145_s0 = smov 4   ;;  %vm39_vm6 = vcmask 359744   ;;  %vm45_vm7 = vcmask 326944   ;;  %vm51_vm8 = vcmask 294144   ;;  %vm57_vm9 = vcmask 261344  }
   0xa   :  { %31 = vrot.lane.b32.xlu0 %v105_v4, %s135_s24  ;;  %37 = vrot.lane.b32.xlu1 %v106_v5, %s136_s25  ;;  %vm63_vm10 = vcmask 228544   ;;  %vm69_vm11 = vcmask 195744   ;;  %vm75_vm12 = vcmask 162944   ;;  %vm81_vm13 = vcmask 130144  }
   0xb   :  { %vm87_vm14 = vcmask 97344   ;;  %vm93_vm15 = vcmask 64544  }
   0xe   :  { %43 = vrot.lane.b32.xlu0 %v107_v7, %s137_s30  ;;  %49 = vrot.lane.b32.xlu1 %v108_v8, %s138_s2 }
  0x12   :  { %55 = vrot.lane.b32.xlu0 %v109_v9, %s139_s7  ;;  %61 = vrot.lane.b32.xlu1 %v110_v10, %s140_s8 }
  0x16   :  { %67 = vrot.lane.b32.xlu0 %v111_v11, %s141_s13  ;;  %73 = vrot.lane.b32.xlu1 %v112_v12, %s142_s14 }
  0x1a   :  { %79 = vrot.lane.b32.xlu0 %v113_v13, %s143_s19  ;;  %85 = vrot.lane.b32.xlu1 %v114_v14, %s144_s20 }
  0x1e   :  { %91 = vrot.lane.b32.xlu0 %v115_v15, %s145_s0 }
  0x74   :  { %v8_v16 = vpop.permute.xlu0 %7   ;;  %v20_v17 = vpop.permute.xlu1 %19  }
  0x75   :  { %10 = vst.msk [vmem:[#allocation0] sm:$0x1] %vm9_vm1, %v8_v16  }
  0x78   :  { %v14_v18 = vpop.permute.xlu0 %13   ;;  %v26_v19 = vpop.permute.xlu1 %25  }
  0x79   :  { %16 = vst.msk [vmem:[#allocation0] sm:$0x1] %vm15_vm2, %v14_v18  }
  0x7a   :  { %22 = vst.msk [vmem:[#allocation0] sm:$0x1] %vm21_vm3, %v20_v17  }
  0x7b   :  { %28 = vst.msk [vmem:[#allocation0] sm:$0x1] %vm27_vm4, %v26_v19  }
  0x7c   :  { %v32_v20 = vpop.permute.xlu0 %31   ;;  %v38_v21 = vpop.permute.xlu1 %37  }
  0x7d   :  { %34 = vst.msk [vmem:[#allocation0] sm:$0x1] %vm33_vm5, %v32_v20  }
  0x7e   :  { %40 = vst.msk [vmem:[#allocation0] sm:$0x1] %vm39_vm6, %v38_v21  }
  0x80   :  { %v44_v22 = vpop.permute.xlu0 %43   ;;  %v50_v23 = vpop.permute.xlu1 %49  }
  0x81   :  { %46 = vst.msk [vmem:[#allocation0] sm:$0x1] %vm45_vm7, %v44_v22  }
  0x82   :  { %52 = vst.msk [vmem:[#allocation0] sm:$0x1] %vm51_vm8, %v50_v23  }
  0x84   :  { %v56_v24 = vpop.permute.xlu0 %55   ;;  %v62_v25 = vpop.permute.xlu1 %61  }
  0x85   :  { %58 = vst.msk [vmem:[#allocation0] sm:$0x1] %vm57_vm9, %v56_v24  }
  0x86   :  { %64 = vst.msk [vmem:[#allocation0] sm:$0x1] %vm63_vm10, %v62_v25  }
  0x88   :  { %v68_v26 = vpop.permute.xlu0 %67   ;;  %v74_v27 = vpop.permute.xlu1 %73  }
  0x89   :  { %70 = vst.msk [vmem:[#allocation0] sm:$0x1] %vm69_vm11, %v68_v26  }
  0x8a   :  { %76 = vst.msk [vmem:[#allocation0] sm:$0x1] %vm75_vm12, %v74_v27  }
  0x8c   :  { %v80_v28 = vpop.permute.xlu0 %79   ;;  %v86_v29 = vpop.permute.xlu1 %85  }
  0x8d   :  { %82 = vst.msk [vmem:[#allocation0] sm:$0x1] %vm81_vm13, %v80_v28  }
  0x8e   :  { %88 = vst.msk [vmem:[#allocation0] sm:$0x1] %vm87_vm14, %v86_v29  }
  0x90   :  { %v92_v30 = vpop.permute.xlu0 %91  }
  0x91   :  { %94 = vst.msk [vmem:[#allocation0] sm:$0x1] %vm93_vm15, %v92_v30  }
  0x98   :  { %v98_v31 = vld [vmem:[#allocation0] sm:$0x1] }
  0x99   :  { %100 = vst [vmem:[%s208_s1] sm:$0x1] %v98_v31 }

// kernel: rfblock_forward_pallas.1
= control target key start
LH: loop header
LB: loop body
LE: loop exit
PB: predicated region body
PF: predicated region fallthrough
CT: control target
= control target key end

     0   :  { %s2594_s17 = smov 0   ;;  %s3106_s0 = inlined_call_operand.vmem [shape: f32[32,128], index: 0, kind: input, shape index: {}]   ;;  %s3107_s1 = inlined_call_operand.vmem [shape: f32[1,128,64], index: 1, kind: input, shape index: {}]   ;;  %s3108_s2 = inlined_call_operand.vmem [shape: f32[1,64], index: 2, kind: input, shape index: {}]   ;;  %s3109_s3 = inlined_call_operand.vmem [shape: f32[3,64,64], index: 3, kind: input, shape index: {}]   ;;  %s3110_s4 = inlined_call_operand.vmem [shape: f32[1,64], index: 4, kind: input, shape index: {}]   ;;  %s3111_s5 = inlined_call_operand.vmem [shape: f32[3,128,64], index: 5, kind: input, shape index: {}]   ;;  %s3112_s6 = inlined_call_operand.vmem [shape: f32[1,64], index: 6, kind: input, shape index: {}]   ;;  %s3113_s7 = inlined_call_operand.vmem [shape: f32[3,64,64], index: 7, kind: input, shape index: {}]   ;;  %s3114_s8 = inlined_call_operand.vmem [shape: f32[1,64], index: 8, kind: input, shape index: {}]   ;;  %s3115_s9 = inlined_call_operand.vmem [shape: f32[2,64,64], index: 9, kind: input, shape index: {}]   ;;  %s3116_s10 = inlined_call_operand.vmem [shape: f32[1,64], index: 10, kind: input, shape index: {}]   ;;  %s3117_s11 = inlined_call_operand.vmem [shape: f32[32,64], index: 11, kind: output, shape index: {}]  }
   0x1 LB: > { %s1698_s18 = sadd.s32 4294967295, %s2532_s17   ;;  %p1702_p0 = scmp.ge.s32.totalorder %s2532_s17, 1  ;;  %s2532_s17 = sphi %s2594_s17, %s21_s17  }
   0x2   : > { %p338_p1 = scmp.lt.s32.totalorder %s2532_s17, 3 }
   0x4   : > { %p339_p2 = pnand %p1702_p0, %p338_p1 }
   0x5   : > { %v419_v0 = vld [vmem:[%s3107_s1] sm:$0xff] (!%p339_p2)  ;;  %v420_v1 = vld [vmem:[%s3107_s1 + $0x8] sm:$0xff] (!%p339_p2)  ;;  %v421_v2 = vld [vmem:[%s3107_s1 + $0x10] sm:$0xff] (!%p339_p2)  ;;  %s1703_s25 = sshll.u32 (!%p339_p2), %s1698_s18, 1  ;;  %v390_v56 = vlaneseq (!%p339_p2)  ;;  %vm553_vm6 = vcmask (!%p339_p2), 523264  }
   0x6   : > { %342 = sbr.rel (%p339_p2) target bundleno = 838 (0x346), region = 64  ;;  %v2248_v3 = vpack.c.bf16 (!%p339_p2), %v420_v1, %v419_v0  ;;  %v422_v4 = vld [vmem:[%s3107_s1 + $0x18] sm:$0xff] (!%p339_p2)  ;;  %p379_p3 = scmp.lt.s32.totalorder (!%p339_p2), %s1703_s25, 3  ;;  %v423_v6 = vld [vmem:[%s3107_s1 + $0x20] sm:$0xff] (!%p339_p2)  ;;  %v424_v7 = vld [vmem:[%s3107_s1 + $0x28] sm:$0xff] (!%p339_p2) }
   0x7   : > { %v2252_v5 = vpack.c.bf16 (!%p339_p2), %v422_v4, %v421_v2  ;;  %v2256_v8 = vpack.c.bf16 (!%p339_p2), %v424_v7, %v423_v6  ;;  %v425_v9 = vld [vmem:[%s3107_s1 + $0x30] sm:$0xff] (!%p339_p2)  ;;  %v426_v10 = vld [vmem:[%s3107_s1 + $0x38] sm:$0xff] (!%p339_p2)  ;;  %v427_v13 = vld [vmem:[%s3107_s1 + $0x40] sm:$0xff] (!%p339_p2)  ;;  %v2735_v60 = vshrl.u32 (!%p339_p2), %v390_v56, 7 }
   0x8   : > { %2249 = vmatprep.subr.bf16.mxu0 (!%p339_p2), %v2248_v3  ;;  %v2260_v12 = vpack.c.bf16 (!%p339_p2), %v426_v10, %v425_v9  ;;  %v428_v14 = vld [vmem:[%s3107_s1 + $0x48] sm:$0xff] (!%p339_p2)  ;;  %v429_v16 = vld [vmem:[%s3107_s1 + $0x50] sm:$0xff] (!%p339_p2)  ;;  %v430_v17 = vld [vmem:[%s3107_s1 + $0x58] sm:$0xff] (!%p339_p2) }
   0x9   : > { %2251 = vmatpush3.bf16.msra.mxu0 (!%p339_p2), %v2248_v3  ;;  %v2264_v15 = vpack.c.bf16 (!%p339_p2), %v428_v14, %v427_v13  ;;  %v2268_v18 = vpack.c.bf16 (!%p339_p2), %v430_v17, %v429_v16  ;;  %v431_v19 = vld [vmem:[%s3107_s1 + $0x60] sm:$0xff] (!%p339_p2)  ;;  %v432_v20 = vld [vmem:[%s3107_s1 + $0x68] sm:$0xff] (!%p339_p2)  ;;  %v433_v22 = vld [vmem:[%s3107_s1 + $0x70] sm:$0xff] (!%p339_p2)  ;;  %v397_v2 = vand.u32 (!%p339_p2), 15, %v2735_v60  ;;  %vm525_vm0 = vcmp.lt.s32.totalorder (!%p339_p2), %v2735_v60, 1 }
   0xa   : > { %2253 = vmatprep.subr.bf16.mxu0 (!%p339_p2), %v2252_v5  ;;  %v2272_v21 = vpack.c.bf16 (!%p339_p2), %v432_v20, %v431_v19  ;;  %v434_v23 = vld [vmem:[%s3107_s1 + $0x78] sm:$0xff] (!%p339_p2)  ;;  %v1708_v24 = vld [vmem:[%s3109_s3 + $0x40] sm:$0xff] (!%p339_p2)  ;;  %v1709_v25 = vld [vmem:[%s3109_s3 + $0x48] sm:$0xff] (!%p339_p2)  ;;  %vm718_vm2 = vcmp.lt.s32.totalorder (!%p339_p2), %v2735_v60, 7  ;;  %v2862_v56 = vadd.s32 (!%p339_p2), 8, %v2735_v60  ;;  %vm1142_vm9 = vcmp.lt.s32.totalorder (!%p339_p2), %v2735_v60, 3 }
   0xb   : > { %v1710_v26 = vld [vmem:[%s3109_s3 + $0x50] sm:$0xff] (!%p339_p2)  ;;  %v2280_v27 = vpack.c.bf16 (!%p339_p2), %v1709_v25, %v1708_v24  ;;  %v1711_v28 = vld [vmem:[%s3109_s3 + $0x58] sm:$0xff] (!%p339_p2)  ;;  %v1712_v30 = vld [vmem:[%s3109_s3 + $0x60] sm:$0xff] (!%p339_p2)  ;;  %v2276_v32 = vpack.c.bf16 (!%p339_p2), %v434_v23, %v433_v22  ;;  %vm2755_vm1 = vcmp.ge.s32.totalorder (!%p339_p2), %v397_v2, 1  ;;  %vm1334_vm10 = vcmp.lt.s32.totalorder (!%p339_p2), %v2735_v60, 5 }
   0xc   : > { %v2284_v29 = vpack.c.bf16 (!%p339_p2), %v1711_v28, %v1710_v26  ;;  %v1713_v31 = vld [vmem:[%s3109_s3 + $0x68] sm:$0xff] (!%p339_p2)  ;;  %v1731_v33 = vld [vmem:[%s3111_s5 + $0x80] sm:$0xff] (!%p339_p2)  ;;  %v1733_v37 = vld [vmem:[%s3111_s5 + $0x90] sm:$0xff] (!%p339_p2)  ;;  %vm1145_vm11 = vcmp.ge.s32.totalorder (!%p339_p2), %v397_v2, 3 }
   0xd   : > { %s3123_s25 = smov (!%p379_p3, %s1703_s25), 3  ;;  %2255 = vmatpush3.bf16.msra.mxu0 %v2252_v5  ;;  %2281 = vmatprep.subr.bf16.mxu1 %v2280_v27  ;;  %v1732_v34 = vld [vmem:[%s3111_s5 + $0x88] sm:$0xff]  ;;  %v2288_v35 = vpack.c.bf16 %v1713_v31, %v1712_v30  ;;  %v1734_v38 = vld [vmem:[%s3111_s5 + $0x98] sm:$0xff]  ;;  %v1735_v41 = vld [vmem:[%s3111_s5 + $0xa0] sm:$0xff] }
   0xe   : > { %s1704_s13 = sshll.u32 %s3123_s25, 3  ;;  %2257 = vmatprep.subr.bf16.mxu0 %v2256_v8  ;;  %2283 = vmatpush3.bf16.msra.mxu1 %v2280_v27  ;;  %v2328_v36 = vpack.c.bf16 %v1732_v34, %v1731_v33  ;;  %v2332_v40 = vpack.c.bf16 %v1734_v38, %v1733_v37  ;;  %v1736_v42 = vld [vmem:[%s3111_s5 + $0xa8] sm:$0xff]  ;;  %v1737_v44 = vld [vmem:[%s3111_s5 + $0xb0] sm:$0xff]  ;;  %v1738_v45 = vld [vmem:[%s3111_s5 + $0xb8] sm:$0xff] }
   0xf   : > { %s2634_s21 = scalar_lea.vmem %s3106_s0, %s1704_s13  ;;  %2285 = vmatprep.subr.bf16.mxu1 %v2284_v29  ;;  %v2336_v43 = vpack.c.bf16 %v1736_v42, %v1735_v41  ;;  %v2340_v46 = vpack.c.bf16 %v1738_v45, %v1737_v44  ;;  %v1739_v47 = vld [vmem:[%s3111_s5 + $0xc0] sm:$0xff]  ;;  %v1740_v48 = vld [vmem:[%s3111_s5 + $0xc8] sm:$0xff]  ;;  %v1741_v50 = vld [vmem:[%s3111_s5 + $0xd0] sm:$0xff]  ;;  %s388_s19 = scalar_lea.vmem %s3117_s11, %s1704_s13 }
  0x10   : > { %v2637_v11 = vld [vmem:[%s2634_s21] sm:$0xff]  ;;  %v2695_v39 = vld [vmem:[%s2634_s21 + $0x8] sm:$0xff]  ;;  %v2344_v49 = vpack.c.bf16 %v1740_v48, %v1739_v47  ;;  %v1742_v51 = vld [vmem:[%s3111_s5 + $0xd8] sm:$0xff] }
  0x11   : > { %1988 = vmatprep.mubr.f32.mxu0 %v2637_v11  ;;  %2259 = vmatpush3.bf16.msra.mxu0 %v2256_v8  ;;  %v2348_v52 = vpack.c.bf16 %v1742_v51, %v1741_v50  ;;  %v1743_v53 = vld [vmem:[%s3111_s5 + $0xe0] sm:$0xff]  ;;  %v1744_v54 = vld [vmem:[%s3111_s5 + $0xe8] sm:$0xff]  ;;  %v1745_v57 = vld [vmem:[%s3111_s5 + $0xf0] sm:$0xff]  ;;  %v836_v63 = vrot.slane %v2637_v11, 7  ;;  %v837_v0 = vrot.slane %v2695_v39, 7  ;;  %v1025_v30 = vrot.slane %v2637_v11, 1 }
  0x12   : > { %2261 = vmatprep.subr.bf16.mxu0 %v2260_v12  ;;  %2287 = vmatpush3.bf16.msra.mxu1 %v2284_v29  ;;  %v2352_v55 = vpack.c.bf16 %v1744_v54, %v1743_v53  ;;  %v1746_v58 = vld [vmem:[%s3111_s5 + $0xf8] sm:$0xff]  ;;  %v842_v61 = vld [vmem:[%s3111_s5] sm:$0xff]  ;;  %v843_v62 = vld [vmem:[%s3111_s5 + $0x8] sm:$0xff]  ;;  %v1026_v31 = vrot.slane %v2695_v39, 1 }
  0x13   : > { %2289 = vmatprep.subr.bf16.mxu1 %v2288_v35  ;;  %v2356_v59 = vpack.c.bf16 %v1746_v58, %v1745_v57  ;;  %v2360_v1 = vpack.c.bf16 %v843_v62, %v842_v61  ;;  %v844_v3 = vld [vmem:[%s3111_s5 + $0x10] sm:$0xff]  ;;  %v845_v4 = vld [vmem:[%s3111_s5 + $0x18] sm:$0xff]  ;;  %v839_v7 = vsel %vm525_vm0, %v837_v0, %v836_v63  ;;  %v846_v8 = vld [vmem:[%s3111_s5 + $0x20] sm:$0xff]  ;;  %v838_v34 = vsel %vm525_vm0, %v836_v63, %v837_v0 }
  0x14   : > { %v2364_v5 = vpack.c.bf16 %v845_v4, %v844_v3  ;;  %v847_v9 = vld [vmem:[%s3111_s5 + $0x28] sm:$0xff]  ;;  %v849_v13 = vld [vmem:[%s3111_s5 + $0x38] sm:$0xff]  ;;  %v856_v24 = vld [vmem:[%s3111_s5 + $0x70] sm:$0xff]  ;;  %v404_v62 = vand.u32 15, %v2862_v56  ;;  %v1028_v0 = vsel %vm718_vm2, %v1026_v31, %v1025_v30 }
  0x15   : > { %2263 = vmatpush3.bf16.msra.mxu0 %v2260_v12  ;;  %v2368_v10 = vpack.c.bf16 %v847_v9, %v846_v8  ;;  %v848_v12 = vld [vmem:[%s3111_s5 + $0x30] sm:$0xff]  ;;  %v851_v16 = vld [vmem:[%s3111_s5 + $0x48] sm:$0xff]  ;;  %v853_v19 = vld [vmem:[%s3111_s5 + $0x58] sm:$0xff] }
  0x16   : > { %2265 = vmatprep.subr.bf16.mxu0 %v2264_v15  ;;  %2291 = vmatpush3.bf16.msra.mxu1 %v2288_v35  ;;  %v2372_v14 = vpack.c.bf16 %v849_v13, %v848_v12  ;;  %v855_v22 = vld [vmem:[%s3111_s5 + $0x68] sm:$0xff]  ;;  %v857_v25 = vld [vmem:[%s3111_s5 + $0x78] sm:$0xff]  ;;  %v1748_v27 = vld [vmem:[%s3111_s5 + $0x100] sm:$0xff]  ;;  %vm2873_vm3 = vcmp.lt.s32.totalorder %v404_v62, 15  ;;  %vm1338_vm12 = vcmp.lt.s32.totalorder %v404_v62, 13 }
  0x17   : > { %v2388_v26 = vpack.c.bf16 %v857_v25, %v856_v24  ;;  %v1749_v28 = vld [vmem:[%s3111_s5 + $0x108] sm:$0xff]  ;;  %v1751_v33 = vld [vmem:[%s3111_s5 + $0x118] sm:$0xff]  ;;  %v1756_v42 = vld [vmem:[%s3111_s5 + $0x140] sm:$0xff] }
  0x18   : > { %v2392_v29 = vpack.c.bf16 %v1749_v28, %v1748_v27  ;;  %v1753_v37 = vld [vmem:[%s3111_s5 + $0x128] sm:$0xff]  ;;  %v1758_v45 = vld [vmem:[%s3111_s5 + $0x150] sm:$0xff]  ;;  %v1760_v48 = vld [vmem:[%s3111_s5 + $0x160] sm:$0xff] }
  0x19   : > { %2267 = vmatpush3.bf16.msra.mxu0 %v2264_v15  ;;  %v850_v15 = vld [vmem:[%s3111_s5 + $0x40] sm:$0xff]  ;;  %v1762_v51 = vld [vmem:[%s3111_s5 + $0x170] sm:$0xff]  ;;  %v1715_v54 = vld [vmem:[%s3109_s3 + $0x78] sm:$0xff] }
  0x1a   : > { %2269 = vmatprep.subr.bf16.mxu0 %v2268_v18  ;;  %v2376_v17 = vpack.c.bf16 %v851_v16, %v850_v15  ;;  %v1714_v53 = vld [vmem:[%s3109_s3 + $0x70] sm:$0xff]  ;;  %v536_v58 = vld [vmem:[%s3109_s3] sm:$0xff]  ;;  %v1721_v6 = vld [vmem:[%s3109_s3 + $0x88] sm:$0xff] }
  0x1b   : > { %v538_v9 = vld [vmem:[%s3109_s3 + $0x10] sm:$0xff]  ;;  %v1778_v60 = vld [vmem:[%s3113_s7 + $0x80] sm:$0xff]  ;;  %v1796_v62 = vld [vmem:[%s3115_s9 + $0x78] sm:$0xff] }
  0x1c   : > { %v542_v28 = vld [vmem:[%s3109_s3 + $0x30] sm:$0xff] }
  0x1d   : > { %2271 = vmatpush3.bf16.msra.mxu0 %v2268_v18  ;;  %v852_v18 = vld [vmem:[%s3111_s5 + $0x50] sm:$0xff] }
  0x1e   : > { %2273 = vmatprep.subr.bf16.mxu0 %v2272_v21  ;;  %v2380_v20 = vpack.c.bf16 %v853_v19, %v852_v18  ;;  %v1795_v56 = vld [vmem:[%s3115_s9 + $0x70] sm:$0xff] }
  0x21   : > { %2275 = vmatpush3.bf16.msra.mxu0 %v2272_v21  ;;  %v854_v21 = vld [vmem:[%s3111_s5 + $0x60] sm:$0xff] }
  0x22   : > { %2277 = vmatprep.subr.bf16.mxu0 %v2276_v32  ;;  %v2384_v23 = vpack.c.bf16 %v855_v22, %v854_v21  ;;  %v541_v21 = vld [vmem:[%s3109_s3 + $0x28] sm:$0xff] }
  0x25   : > { %2279 = vmatpush3.bf16.msra.mxu0 %v2276_v32  ;;  %v1750_v32 = vld [vmem:[%s3111_s5 + $0x110] sm:$0xff] }
  0x26   : > { %2329 = vmatprep.subr.bf16.mxu0 %v2328_v36  ;;  %v2396_v35 = vpack.c.bf16 %v1751_v33, %v1750_v32  ;;  %v1722_v33 = vld [vmem:[%s3109_s3 + $0x90] sm:$0xff] }
  0x28   : > { %1989 = vmatmul.mubr.f32.vlgmr.msra.gmra.mrb[0].mxu0 %v2695_v39 }
  0x29   : > { %2331 = vmatpush3.bf16.msra.mxu0 %v2328_v36  ;;  %2080 = vmatprep.mubr.f32.mxu0 %v2637_v11  ;;  %v1027_v11 = vsel %vm718_vm2, %v1025_v30, %v1026_v31  ;;  %v1752_v36 = vld [vmem:[%s3111_s5 + $0x120] sm:$0xff] }
  0x2a   : > { %2333 = vmatprep.subr.bf16.mxu0 %v2332_v40  ;;  %v2400_v38 = vpack.c.bf16 %v1753_v37, %v1752_v36  ;;  %v1720_v31 = vld [vmem:[%s3109_s3 + $0x80] sm:$0xff]  ;;  %v1725_v36 = vld [vmem:[%s3109_s3 + $0xa8] sm:$0xff] }
  0x2b   : > { %v2312_v32 = vpack.c.bf16 %v1721_v6, %v1720_v31  ;;  %v1783_v31 = vld [vmem:[%s3113_s7 + $0xa8] sm:$0xff] }
  0x2d   : > { %2335 = vmatpush3.bf16.msra.mxu0 %v2332_v40  ;;  %v1755_v40 = vld [vmem:[%s3111_s5 + $0x138] sm:$0xff] }
  0x2e   : > { %2337 = vmatprep.subr.bf16.mxu0 %v2336_v43 }
  0x31   : > { %2339 = vmatpush3.bf16.msra.mxu0 %v2336_v43  ;;  %v1757_v43 = vld [vmem:[%s3111_s5 + $0x148] sm:$0xff] }
  0x32   : > { %2341 = vmatprep.subr.bf16.mxu0 %v2340_v46  ;;  %v2408_v44 = vpack.c.bf16 %v1757_v43, %v1756_v42  ;;  %v1767_v42 = vld [vmem:[%s3113_s7 + $0x48] sm:$0xff] }
  0x35   : > { %2343 = vmatpush3.bf16.msra.mxu0 %v2340_v46  ;;  %v1759_v46 = vld [vmem:[%s3111_s5 + $0x158] sm:$0xff] }
  0x36   : > { %2345 = vmatprep.subr.bf16.mxu0 %v2344_v49  ;;  %v2412_v47 = vpack.c.bf16 %v1759_v46, %v1758_v45  ;;  %v1769_v45 = vld [vmem:[%s3113_s7 + $0x58] sm:$0xff] }
  0x39   : > { %2347 = vmatpush3.bf16.msra.mxu0 %v2344_v49  ;;  %v1761_v49 = vld [vmem:[%s3111_s5 + $0x168] sm:$0xff] }
  0x3a   : > { %2349 = vmatprep.subr.bf16.mxu0 %v2348_v52  ;;  %v2416_v50 = vpack.c.bf16 %v1761_v49, %v1760_v48  ;;  %v1770_v48 = vld [vmem:[%s3113_s7 + $0x60] sm:$0xff]  ;;  %v1771_v49 = vld [vmem:[%s3113_s7 + $0x68] sm:$0xff] }
  0x3d   : > { %2351 = vmatpush3.bf16.msra.mxu0 %v2348_v52  ;;  %v1763_v52 = vld [vmem:[%s3111_s5 + $0x178] sm:$0xff] }
  0x3e   : > { %2353 = vmatprep.subr.bf16.mxu0 %v2352_v55  ;;  %v2420_v57 = vpack.c.bf16 %v1763_v52, %v1762_v51  ;;  %v1772_v51 = vld [vmem:[%s3113_s7 + $0x70] sm:$0xff]  ;;  %v1773_v52 = vld [vmem:[%s3113_s7 + $0x78] sm:$0xff] }
  0x41   : > { %2355 = vmatpush3.bf16.msra.mxu0 %v2352_v55  ;;  %v2292_v55 = vpack.c.bf16 %v1715_v54, %v1714_v53  ;;  %v2436_v53 = vpack.c.bf16 %v1773_v52, %v1772_v51  ;;  %v1153_v54 = vld [vmem:[%s3113_s7] sm:$0xff] }
  0x42   : > { %2357 = vmatprep.subr.bf16.mxu0 %v2356_v59  ;;  %v1788_v51 = vld [vmem:[%s3114_s8] ss:$0 sm:$0xff] }
  0x43   : > { %2293 = vmatprep.subr.bf16.mxu1 %v2292_v55 }
  0x44   : > { %2295 = vmatpush3.bf16.msra.mxu1 %v2292_v55  ;;  %v1154_v55 = vld [vmem:[%s3113_s7 + $0x8] sm:$0xff] }
  0x45   : > { %2359 = vmatpush3.bf16.msra.mxu0 %v2356_v59  ;;  %v537_v59 = vld [vmem:[%s3109_s3 + $0x8] sm:$0xff] }
  0x46   : > { %2361 = vmatprep.subr.bf16.mxu0 %v2360_v1  ;;  %v2296_v61 = vpack.c.bf16 %v537_v59, %v536_v58  ;;  %v1765_v58 = vld [vmem:[%s3112_s6] ss:$0 sm:$0xff] }
  0x48   : > { %2081 = vmatmul.mubr.f32.vlgmr.msra.gmra.mrb[2].mxu0 %v2695_v39  ;;  %v1754_v39 = vld [vmem:[%s3111_s5 + $0x130] sm:$0xff]  ;;  %2297 = vmatprep.subr.bf16.mxu1 %v2296_v61 }
  0x49   : > { %2363 = vmatpush3.bf16.msra.mxu0 %v2360_v1  ;;  %2115 = vmatprep.mubr.msk.f32.mxu0 %vm2755_vm1, %v839_v7  ;;  %v2404_v41 = vpack.c.bf16 %v1755_v40, %v1754_v39  ;;  %v1707_v1 = vld [vmem:[%s3108_s2] ss:$0 sm:$0xff]  ;;  %v1727_v39 = vld [vmem:[%s3109_s3 + $0xb8] sm:$0xff] }
  0x4a   : > { %2365 = vmatprep.subr.bf16.mxu0 %v2364_v5 }
  0x4d   : > { %2367 = vmatpush3.bf16.msra.mxu0 %v2364_v5 }
  0x4e   : > { %2369 = vmatprep.subr.bf16.mxu0 %v2368_v10 }
  0x51   : > { %2371 = vmatpush3.bf16.msra.mxu0 %v2368_v10  ;;  %v539_v10 = vld [vmem:[%s3109_s3 + $0x18] sm:$0xff] }
  0x52   : > { %2373 = vmatprep.subr.bf16.mxu0 %v2372_v14 }
  0x55   : > { %2375 = vmatpush3.bf16.msra.mxu0 %v2372_v14 }
  0x56   : > { %2377 = vmatprep.subr.bf16.mxu0 %v2376_v17 }
  0x59   : > { %2379 = vmatpush3.bf16.msra.mxu0 %v2376_v17  ;;  %v2300_v17 = vpack.c.bf16 %v539_v10, %v538_v9 }
  0x5a   : > { %2381 = vmatprep.subr.bf16.mxu0 %v2380_v20 }
  0x5d   : > { %2383 = vmatpush3.bf16.msra.mxu0 %v2380_v20  ;;  %v540_v20 = vld [vmem:[%s3109_s3 + $0x20] sm:$0xff] }
  0x5e   : > { %2385 = vmatprep.subr.bf16.mxu0 %v2384_v23  ;;  %v2304_v27 = vpack.c.bf16 %v541_v21, %v540_v20 }
  0x61   : > { %2387 = vmatpush3.bf16.msra.mxu0 %v2384_v23 }
  0x62   : > { %2389 = vmatprep.subr.bf16.mxu0 %v2388_v26 }
  0x65   : > { %2391 = vmatpush3.bf16.msra.mxu0 %v2388_v26 }
  0x66   : > { %2393 = vmatprep.subr.bf16.mxu0 %v2392_v29 }
  0x68   : > { %2116 = vmatmul.mubr.f32.vlgmr.msra.gmra.mrb[2].mxu0 %v838_v34  ;;  %v1723_v34 = vld [vmem:[%s3109_s3 + $0x98] sm:$0xff] }
  0x69   : > { %2395 = vmatpush3.bf16.msra.mxu0 %v2392_v29  ;;  %2150 = vmatprep.mubr.f32.mxu0 %v1027_v11  ;;  %v543_v29 = vld [vmem:[%s3109_s3 + $0x38] sm:$0xff]  ;;  %v1724_v11 = vld [vmem:[%s3109_s3 + $0xa0] sm:$0xff] }
  0x6a   : > { %2397 = vmatprep.subr.bf16.mxu0 %v2396_v35  ;;  %v2308_v30 = vpack.c.bf16 %v543_v29, %v542_v28  ;;  %v2320_v37 = vpack.c.bf16 %v1725_v36, %v1724_v11  ;;  %v1781_v28 = vld [vmem:[%s3113_s7 + $0x98] sm:$0xff]  ;;  %v1790_v11 = vld [vmem:[%s3115_s9 + $0x48] sm:$0xff] }
  0x6d   : > { %2399 = vmatpush3.bf16.msra.mxu0 %v2396_v35  ;;  %v2316_v35 = vpack.c.bf16 %v1723_v34, %v1722_v33  ;;  %v1785_v33 = vld [vmem:[%s3113_s7 + $0xb8] sm:$0xff] }
  0x6e   : > { %2401 = vmatprep.subr.bf16.mxu0 %v2400_v38 }
  0x71   : > { %2403 = vmatpush3.bf16.msra.mxu0 %v2400_v38  ;;  %v1726_v38 = vld [vmem:[%s3109_s3 + $0xb0] sm:$0xff] }
  0x72   : > { %2405 = vmatprep.subr.bf16.mxu0 %v2404_v41  ;;  %v2324_v40 = vpack.c.bf16 %v1727_v39, %v1726_v38  ;;  %v1792_v38 = vld [vmem:[%s3115_s9 + $0x58] sm:$0xff] }
  0x75   : > { %2407 = vmatpush3.bf16.msra.mxu0 %v2404_v41  ;;  %v1766_v41 = vld [vmem:[%s3113_s7 + $0x40] sm:$0xff] }
  0x76   : > { %2409 = vmatprep.subr.bf16.mxu0 %v2408_v44  ;;  %v2424_v43 = vpack.c.bf16 %v1767_v42, %v1766_v41  ;;  %v1793_v41 = vld [vmem:[%s3115_s9 + $0x60] sm:$0xff]  ;;  %v1794_v42 = vld [vmem:[%s3115_s9 + $0x68] sm:$0xff] }
  0x79   : > { %2411 = vmatpush3.bf16.msra.mxu0 %v2408_v44  ;;  %v1768_v44 = vld [vmem:[%s3113_s7 + $0x50] sm:$0xff] }
  0x7a   : > { %2413 = vmatprep.subr.bf16.mxu0 %v2412_v47  ;;  %v2428_v46 = vpack.c.bf16 %v1769_v45, %v1768_v44  ;;  %v2484_v44 = vpack.c.bf16 %v1796_v62, %v1795_v56  ;;  %v1452_v45 = vld [vmem:[%s3115_s9] sm:$0xff] }
  0x7d   : > { %2415 = vmatpush3.bf16.msra.mxu0 %v2412_v47 }
  0x7e   : > { %2417 = vmatprep.subr.bf16.mxu0 %v2416_v50 }
  0x81   : > { %2419 = vmatpush3.bf16.msra.mxu0 %v2416_v50  ;;  %v2432_v50 = vpack.c.bf16 %v1771_v49, %v1770_v48 }
  0x82   : > { %2421 = vmatprep.subr.bf16.mxu0 %v2420_v57 }
  0x85   : > { %2423 = vmatpush3.bf16.msra.mxu0 %v2420_v57  ;;  %v2440_v57 = vpack.c.bf16 %v1154_v55, %v1153_v54 }
  0x88   : > { %2151 = vmatmul.mubr.msk.f32.vlgmr.msra.gmra.mrb[2].mxu0 %vm2873_vm3, %v1028_v0 }
  0xfb   : > { %v1990_v3 = vpop.f32.mrb[0].mxu0 }
  0xfc   : > { %v514_v4 = vadd.f32 %v1990_v3, %v1707_v1  ;;  %v508_v5 = vpop.f32.mrb[1].mxu0  ;;  %v1155_v3 = vld [vmem:[%s3113_s7 + $0x10] sm:$0xff] }
  0xfd   : > { %v509_v7 = vadd.f32 %v1707_v1, %v508_v5 }
  0xfe   : > { %vm518_vm4 = vcmp.ge.f32.partialorder %v514_v4, 0.0  ;;  %v520_v8 = vmul.f32 0.1, %v514_v4 }
  0xff   : > { %v519_v12 = vmul.f32 0.1, %v509_v7  ;;  %vm517_vm5 = vcmp.ge.f32.partialorder %v509_v7, 0.0 }
 0x100   : > { %v522_v13 = vsel %vm518_vm4, %v514_v4, %v520_v8  ;;  %v1156_v4 = vld [vmem:[%s3113_s7 + $0x18] sm:$0xff] }
 0x101   : > { %v521_v14 = vsel %vm517_vm5, %v509_v7, %v519_v12  ;;  %v524_v15 = vrot.slane %v522_v13, 7  ;;  %v717_v16 = vrot.slane %v522_v13, 1  ;;  %v2444_v12 = vpack.c.bf16 %v1156_v4, %v1155_v3 }
 0x102   : > { %v523_v18 = vrot.slane %v521_v14, 7  ;;  %2007 = vmatprep.mubr.msk.f32.mxu1 %vm553_vm6, %v521_v14  ;;  %v716_v19 = vrot.slane %v521_v14, 1 }
 0x103   : > { %2008 = vmatmul.mubr.msk.f32.vlgmr.msra.gmra.mrb[0].mxu1 %vm553_vm6, %v522_v13 }
 0x104   : > { %2299 = vmatpush3.bf16.msra.mxu1 %v2296_v61  ;;  %v527_v22 = vsel %vm525_vm0, %v524_v15, %v523_v18  ;;  %v526_v23 = vsel %vm525_vm0, %v523_v18, %v524_v15  ;;  %v719_v24 = vsel %vm718_vm2, %v716_v19, %v717_v16  ;;  %v720_v25 = vsel %vm718_vm2, %v717_v16, %v716_v19  ;;  %v1157_v15 = vld [vmem:[%s3113_s7 + $0x20] sm:$0xff]  ;;  %v1158_v16 = vld [vmem:[%s3113_s7 + $0x28] sm:$0xff] }
 0x105   : > { %2301 = vmatprep.subr.bf16.mxu1 %v2300_v17  ;;  %v534_v26 = vsel %vm2755_vm1, %v527_v22, 0.0  ;;  %v728_v47 = vsel %vm2873_vm3, %v720_v25, 0.0  ;;  %v2448_v21 = vpack.c.bf16 %v1158_v16, %v1157_v15  ;;  %v1159_v22 = vld [vmem:[%s3113_s7 + $0x30] sm:$0xff]  ;;  %v1779_v25 = vld [vmem:[%s3113_s7 + $0x88] sm:$0xff] }
 0x106   : > { %2026 = vmatprep.mubr.msk.f32.mxu1 %vm553_vm6, %v534_v26  ;;  %v2456_v26 = vpack.c.bf16 %v1779_v25, %v1778_v60 }
 0x108   : > { %2303 = vmatpush3.bf16.msra.mxu1 %v2300_v17 }
 0x109   : > { %2305 = vmatprep.subr.bf16.mxu1 %v2304_v27 }
 0x10c   : > { %2307 = vmatpush3.bf16.msra.mxu1 %v2304_v27  ;;  %v1780_v27 = vld [vmem:[%s3113_s7 + $0x90] sm:$0xff] }
 0x10d   : > { %2309 = vmatprep.subr.bf16.mxu1 %v2308_v30  ;;  %v2460_v29 = vpack.c.bf16 %v1781_v28, %v1780_v27 }
 0x110   : > { %2311 = vmatpush3.bf16.msra.mxu1 %v2308_v30  ;;  %v1782_v30 = vld [vmem:[%s3113_s7 + $0xa0] sm:$0xff] }
 0x111   : > { %2313 = vmatprep.subr.bf16.mxu1 %v2312_v32  ;;  %v2464_v6 = vpack.c.bf16 %v1783_v31, %v1782_v30 }
 0x113   : > { %2027 = vmatmul.mubr.msk.f32.vlgmr.msra.gmra.mrb[0].mxu1 %vm553_vm6, %v526_v23  ;;  %v1160_v23 = vld [vmem:[%s3113_s7 + $0x38] sm:$0xff] }
 0x114   : > { %2315 = vmatpush3.bf16.msra.mxu1 %v2312_v32  ;;  %2045 = vmatprep.mubr.msk.f32.mxu1 %vm553_vm6, %v719_v24  ;;  %v2452_v24 = vpack.c.bf16 %v1160_v23, %v1159_v22  ;;  %v1784_v32 = vld [vmem:[%s3113_s7 + $0xb0] sm:$0xff] }
 0x115   : > { %2317 = vmatprep.subr.bf16.mxu1 %v2316_v35  ;;  %v2468_v34 = vpack.c.bf16 %v1785_v33, %v1784_v32 }
 0x118   : > { %2319 = vmatpush3.bf16.msra.mxu1 %v2316_v35  ;;  %v1789_v35 = vld [vmem:[%s3115_s9 + $0x40] sm:$0xff] }
 0x119   : > { %2321 = vmatprep.subr.bf16.mxu1 %v2320_v37  ;;  %v2472_v36 = vpack.c.bf16 %v1790_v11, %v1789_v35 }
 0x11c   : > { %2323 = vmatpush3.bf16.msra.mxu1 %v2320_v37  ;;  %v1791_v37 = vld [vmem:[%s3115_s9 + $0x50] sm:$0xff] }
 0x11d   : > { %2325 = vmatprep.subr.bf16.mxu1 %v2324_v40  ;;  %v2476_v39 = vpack.c.bf16 %v1792_v38, %v1791_v37 }
 0x120   : > { %2327 = vmatpush3.bf16.msra.mxu1 %v2324_v40 }
 0x121   : > { %2425 = vmatprep.subr.bf16.mxu1 %v2424_v43 }
 0x123   : > { %2046 = vmatmul.mubr.msk.f32.vlgmr.msra.gmra.mrb[0].mxu1 %vm553_vm6, %v728_v47 }
 0x124   : > { %2427 = vmatpush3.bf16.msra.mxu1 %v2424_v43  ;;  %v2480_v43 = vpack.c.bf16 %v1794_v42, %v1793_v41 }
 0x125   : > { %2429 = vmatprep.subr.bf16.mxu1 %v2428_v46 }
 0x128   : > { %2431 = vmatpush3.bf16.msra.mxu1 %v2428_v46  ;;  %v1453_v46 = vld [vmem:[%s3115_s9 + $0x8] sm:$0xff] }
 0x129   : > { %2433 = vmatprep.subr.bf16.mxu1 %v2432_v50  ;;  %v2488_v47 = vpack.c.bf16 %v1453_v46, %v1452_v45 }
 0x12c   : > { %2435 = vmatpush3.bf16.msra.mxu1 %v2432_v50  ;;  %v1730_v50 = vld [vmem:[%s3110_s4] ss:$0 sm:$0xff] }
 0x12d   : > { %2437 = vmatprep.subr.bf16.mxu1 %v2436_v53 }
 0x130   : > { %2439 = vmatpush3.bf16.msra.mxu1 %v2436_v53 }
 0x131   : > { %2441 = vmatprep.subr.bf16.mxu1 %v2440_v57 }
 0x15b   : > { %v2152_v59 = vpop.f32.mrb[2].mxu0 }
 0x15c   : > { %v1133_v61 = vadd.f32 %v2152_v59, %v1765_v58  ;;  %v1114_v63 = vpop.f32.mrb[3].mxu0  ;;  %v1454_v59 = vld [vmem:[%s3115_s9 + $0x10] sm:$0xff] }
 0x15d   : > { %v1132_v0 = vadd.f32 %v1765_v58, %v1114_v63 }
 0x15e   : > { %vm1135_vm7 = vcmp.ge.f32.partialorder %v1133_v61, 0.0  ;;  %v1137_v1 = vmul.f32 0.1, %v1133_v61 }
 0x15f   : > { %vm1134_vm8 = vcmp.ge.f32.partialorder %v1132_v0, 0.0  ;;  %v1136_v5 = vmul.f32 0.1, %v1132_v0 }
 0x160   : > { %v1139_v7 = vsel %vm1135_vm7, %v1133_v61, %v1137_v1  ;;  %v1455_v61 = vld [vmem:[%s3115_s9 + $0x18] sm:$0xff] }
 0x161   : > { %v1141_v8 = vrot.slane %v1139_v7, 5  ;;  %v1333_v9 = vrot.slane %v1139_v7, 3  ;;  %v1138_v10 = vsel %vm1134_vm8, %v1132_v0, %v1136_v5  ;;  %v2492_v3 = vpack.c.bf16 %v1455_v61, %v1454_v59  ;;  %v1456_v5 = vld [vmem:[%s3115_s9 + $0x20] sm:$0xff] }
 0x162   : > { %v1140_v13 = vrot.slane %v1138_v10, 5  ;;  %2169 = vmatprep.mubr.msk.f32.mxu1 %vm553_vm6, %v1138_v10  ;;  %v1332_v14 = vrot.slane %v1138_v10, 3  ;;  %v1458_v10 = vld [vmem:[%s3115_s9 + $0x30] sm:$0xff] }
 0x163   : > { %2170 = vmatmul.mubr.msk.f32.vlgmr.msra.gmra.mrb[2].mxu1 %vm553_vm6, %v1139_v7  ;;  %v1457_v7 = vld [vmem:[%s3115_s9 + $0x28] sm:$0xff] }
 0x164   : > { %2443 = vmatpush3.bf16.msra.mxu1 %v2440_v57  ;;  %v1144_v17 = vsel %vm1142_vm9, %v1141_v8, %v1140_v13  ;;  %v1143_v18 = vsel %vm1142_vm9, %v1140_v13, %v1141_v8  ;;  %v1335_v19 = vsel %vm1334_vm10, %v1332_v14, %v1333_v9  ;;  %v1336_v20 = vsel %vm1334_vm10, %v1333_v9, %v1332_v14 }
 0x165   : > { %2445 = vmatprep.subr.bf16.mxu1 %v2444_v12  ;;  %v1151_v2 = vsel %vm1145_vm11, %v1144_v17, 0.0  ;;  %v1344_v40 = vsel %vm1338_vm12, %v1336_v20, 0.0  ;;  %v2496_v9 = vpack.c.bf16 %v1457_v7, %v1456_v5  ;;  %v1801_v17 = vld [vmem:[%s3116_s10] ss:$0 sm:$0xff] }
 0x166   : > { %2188 = vmatprep.mubr.msk.f32.mxu1 %vm553_vm6, %v1151_v2 }
 0x168   : > { %2447 = vmatpush3.bf16.msra.mxu1 %v2444_v12  ;;  %v1459_v12 = vld [vmem:[%s3115_s9 + $0x38] sm:$0xff] }
 0x169   : > { %2449 = vmatprep.subr.bf16.mxu1 %v2448_v21  ;;  %v2500_v13 = vpack.c.bf16 %v1459_v12, %v1458_v10 }
 0x16c   : > { %2451 = vmatpush3.bf16.msra.mxu1 %v2448_v21 }
 0x16d   : > { %2453 = vmatprep.subr.bf16.mxu1 %v2452_v24 }
 0x170   : > { %2455 = vmatpush3.bf16.msra.mxu1 %v2452_v24 }
 0x171   : > { %2457 = vmatprep.subr.bf16.mxu1 %v2456_v26 }
 0x173   : > { %2189 = vmatmul.mubr.msk.f32.vlgmr.msra.gmra.mrb[2].mxu1 %vm553_vm6, %v1143_v18 }
 0x174   : > { %2459 = vmatpush3.bf16.msra.mxu1 %v2456_v26  ;;  %2207 = vmatprep.mubr.msk.f32.mxu1 %vm553_vm6, %v1335_v19 }
 0x175   : > { %2461 = vmatprep.subr.bf16.mxu1 %v2460_v29 }
 0x178   : > { %2463 = vmatpush3.bf16.msra.mxu1 %v2460_v29 }
 0x179   : > { %2465 = vmatprep.subr.bf16.mxu1 %v2464_v6 }
 0x17c   : > { %2467 = vmatpush3.bf16.msra.mxu1 %v2464_v6 }
 0x17d   : > { %2469 = vmatprep.subr.bf16.mxu1 %v2468_v34 }
 0x180   : > { %2471 = vmatpush3.bf16.msra.mxu1 %v2468_v34 }
 0x181   : > { %2473 = vmatprep.subr.bf16.mxu1 %v2472_v36 }
 0x183   : > { %2208 = vmatmul.mubr.msk.f32.vlgmr.msra.gmra.mrb[2].mxu1 %vm553_vm6, %v1344_v40 }
 0x184   : > { %2475 = vmatpush3.bf16.msra.mxu1 %v2472_v36 }
 0x185   : > { %2477 = vmatprep.subr.bf16.mxu1 %v2476_v39 }
 0x188   : > { %2479 = vmatpush3.bf16.msra.mxu1 %v2476_v39 }
 0x189   : > { %2481 = vmatprep.subr.bf16.mxu1 %v2480_v43 }
 0x18c   : > { %2483 = vmatpush3.bf16.msra.mxu1 %v2480_v43 }
 0x18d   : > { %2485 = vmatprep.subr.bf16.mxu1 %v2484_v44 }
 0x190   : > { %2487 = vmatpush3.bf16.msra.mxu1 %v2484_v44 }
 0x191   : > { %2489 = vmatprep.subr.bf16.mxu1 %v2488_v47 }
 0x1f6   : > { %v2047_v48 = vpop.f32.mrb[0].mxu1 }
 0x1f7   : > { %v810_v49 = vpop.f32.mrb[1].mxu1  ;;  %v829_v14 = vadd.f32 %v2047_v48, %v1730_v50 }
 0x1f8   : > { %v828_v52 = vadd.f32 %v1730_v50, %v810_v49 }
 0x1f9   : > { %v833_v15 = vmul.f32 0.1, %v829_v14  ;;  %vm831_vm0 = vcmp.ge.f32.partialorder %v829_v14, 0.0 }
 0x1fa   : > { %v832_v63 = vmul.f32 0.1, %v828_v52  ;;  %vm830_vm15 = vcmp.ge.f32.partialorder %v828_v52, 0.0 }
 0x1fb   : > { %v835_v16 = vsel %vm831_vm0, %v829_v14, %v833_v15 }
 0x1fc   : > { %v834_v8 = vsel %vm830_vm15, %v828_v52, %v832_v63 }
 0x256   : > { %v2209_v53 = vpop.f32.mrb[2].mxu1 }
 0x257   : > { %v1445_v54 = vadd.f32 %v2209_v53, %v1788_v51  ;;  %v1426_v55 = vpop.f32.mrb[3].mxu1 }
 0x258   : > { %v1444_v57 = vadd.f32 %v1788_v51, %v1426_v55 }
 0x259   : > { %v1449_v58 = vmul.f32 0.1, %v1445_v54  ;;  %vm1447_vm13 = vcmp.ge.f32.partialorder %v1445_v54, 0.0 }
 0x25a   : > { %vm1446_vm14 = vcmp.ge.f32.partialorder %v1444_v57, 0.0  ;;  %v1448_v0 = vmul.f32 0.1, %v1444_v57 }
 0x25b   : > { %v1451_v4 = vsel %vm1447_vm13, %v1445_v54, %v1449_v58 }
 0x25c   : > { %v1450_v1 = vsel %vm1446_vm14, %v1444_v57, %v1448_v0 }
 0x25d   : > { %2226 = vmatprep.mubr.msk.f32.mxu1 %vm553_vm6, %v1450_v1 }
 0x25e   : > { %2227 = vmatmul.mubr.msk.f32.vlgmr.msra.gmra.mrb[4].mxu1 %vm553_vm6, %v1451_v4 }
 0x25f   : > { %2491 = vmatpush3.bf16.msra.mxu1 %v2488_v47  ;;  %2245 = vmatprep.mubr.msk.f32.mxu1 %vm553_vm6, %v834_v8 }
 0x260   : > { %2493 = vmatprep.subr.bf16.mxu1 %v2492_v3 }
 0x263   : > { %2495 = vmatpush3.bf16.msra.mxu1 %v2492_v3 }
 0x264   : > { %2497 = vmatprep.subr.bf16.mxu1 %v2496_v9 }
 0x267   : > { %2499 = vmatpush3.bf16.msra.mxu1 %v2496_v9 }
 0x268   : > { %2501 = vmatprep.subr.bf16.mxu1 %v2500_v13 }
 0x26b   : > { %2503 = vmatpush3.bf16.msra.mxu1 %v2500_v13 }
 0x26e   : > { %2246 = vmatmul.mubr.msk.f32.vlgmr.msra.gmra.mrb[4].mxu1 %vm553_vm6, %v835_v16 }
 0x341   : > { %v2247_v18 = vpop.f32.mrb[4].mxu1 }
 0x342   : > { %v1622_v19 = vpop.f32.mrb[5].mxu1  ;;  %v1639_v2 = vadd.f32 %v2247_v18, %v1801_v17 }
 0x343   : > { %v1638_v20 = vadd.f32 %v1801_v17, %v1622_v19 }
 0x344   : > { %1641 = vst.msk [vmem:[%s388_s19 + $0x8] sm:$0xff] %vm553_vm6, %v1639_v2 }
 0x345   : > { %1640 = vst.msk [vmem:[%s388_s19] sm:$0xff] %vm553_vm6, %v1638_v20 }
 0x346 PF: > { %s21_s17 = sadd.s32 1, %s2532_s17  }
 0x347   : > { %p18_p4 = scmp.ge.s32.totalorder %s21_s17, 4  }
 0x349   :  { %20 = sbr.rel (!%p18_p4) target bundleno = 1 (0x1), region = 101 }

</bundles_post_ra>
